<compile_context>
chip_gen: v5e
topology: v5e:2x2
jax: 0.10.0
libtpu: 0.0.40
codegen_flags: <defaults>
</compile_context>

<pallas_src>
import functools

import jax
import jax.numpy as jnp
import numpy as np
from jax.experimental import pallas as pl
from jax.experimental.pallas import tpu as pltpu


def _leaky_relu(x, slope):
    return jnp.where(x >= 0, x, slope * x)


def informed_sender_kernel(x_ref, w1_ref, w2_ref, wlin_ref, out_ref,
                           *, inv_temp, slope):
    """Single-invocation kernel (all operands resident in VMEM).

    x_ref:    (B, G, E) f32   input, exactly as the module receives it
    w1_ref:   (H, G)    f32   conv1 weight (squeezed)
    w2_ref:   (H, 1)    f32   conv2 weight (squeezed, column form)
    wlin_ref: (H, E)    f32   lin1 weight (NOT transposed)
    out_ref:  (B, H)    f32
    """
    B, _, _ = x_ref.shape
    H, G = w1_ref.shape

    x = x_ref[...]                                              # (B, G, E)

    # Stage 1 (conv1): one batched MXU matmul contracting G.
    #   (B, H, G) @ (B, G, E) -> (B, H, E)
    w1b = jnp.broadcast_to(w1_ref[...][None, :, :], (B, H, G))
    h1 = jax.lax.dot_general(
        w1b, x,
        dimension_numbers=(((2,), (1,)), ((0,), (0,))),
        preferred_element_type=jnp.float32)                     # (B, H, E)
    h1 = _leaky_relu(h1, slope)

    # Stage 2 (conv2): 1-row contraction over H done on VPU (broadcast multiply)
    # + XLU (sublane reduction), not a 1-row MXU matmul.  1/temp is folded into
    # w2 here (exact for temp > 0: LeakyReLU is positively homogeneous and lin1
    # is linear) so no full-output multiply is needed later.
    if inv_temp > 0:
        w2s = w2_ref[...] * inv_temp                            # (H, 1), 32-elem mul
        out_scale = None
    else:  # static fallback; never taken for a sane temperature
        w2s = w2_ref[...]
        out_scale = inv_temp
    h2 = jnp.sum(w2s[None, :, :] * h1, axis=1)                  # (B, E)
    h2 = _leaky_relu(h2, slope)

    # Stage 3 (lin1): single MXU matmul contracting on E (wlin kept as (H, E)),
    # then ONE lane-dense (B, H) store.
    out = jax.lax.dot_general(
        h2, wlin_ref[...],
        dimension_numbers=(((1,), (1,)), ((), ())),
        preferred_element_type=jnp.float32)                     # (B, H)
    if out_scale is not None:
        out = out * out_scale
    out_ref[...] = out.astype(out_ref.dtype)


def informed_sender_forward(x, w1, w2, wlin, temp, slope=0.01):
    """x: (B, G, E); w1: (H, G); w2: (1, H); wlin: (H, E). Returns (B, H)."""
    B, G, E = x.shape
    H = w1.shape[0]

    # Only wrapper op: give w2 a lane-broadcastable column form (free reshape,
    # no data movement).  x goes in untouched -- no extra HBM pass.
    w2col = jnp.reshape(w2, (H, 1))

    kernel = functools.partial(
        informed_sender_kernel, inv_temp=1.0 / temp, slope=slope)
    return pl.pallas_call(
        kernel,
        out_shape=jax.ShapeDtypeStruct((B, H), jnp.float32),
        in_specs=[
            pl.BlockSpec(memory_space=pltpu.MemorySpace.VMEM),
            pl.BlockSpec(memory_space=pltpu.MemorySpace.VMEM),
            pl.BlockSpec(memory_space=pltpu.MemorySpace.VMEM),
            pl.BlockSpec(memory_space=pltpu.MemorySpace.VMEM),
        ],
        out_specs=pl.BlockSpec(memory_space=pltpu.MemorySpace.VMEM),
    )(x, w1, w2col, wlin)


def informed_sender_reference(x, w1, w2, wlin, temp, slope=0.01):
    """Pure-JAX reference of the PyTorch forward."""
    h1 = jnp.einsum("hg,bge->bhe", w1, x)                 # conv1
    h1 = jnp.where(h1 >= 0, h1, slope * h1)
    h2 = jnp.einsum("h,bhe->be", w2[0], h1)               # conv2
    h2 = jnp.where(h2 >= 0, h2, slope * h2)
    out = jnp.einsum("be,he->bh", h2, wlin)               # lin1
    return out * (1.0 / temp)


if __name__ == "__main__":
    # Module hyperparameters (small, consistent with the forward pass)
    batch = 2
    game_size = 4
    embedding_size = 16
    hidden_size = 32
    vocab_size = 8   # not used by forward (quirk of the original module)
    temp = 0.7

    key = jax.random.PRNGKey(0)
    kx, k1, k2, k3 = jax.random.split(key, 4)

    # Input (B, game_size, embedding_size)
    x = jax.random.normal(kx, (batch, game_size, embedding_size), jnp.float32)

    # Parameter init (PyTorch parameter shapes, squeezed):
    #   conv1.weight: (hidden, 1, game_size, 1) -> (hidden, game_size)
    #   conv2.weight: (1, 1, hidden, 1)         -> (1, hidden)
    #   lin1.weight:  (hidden, embedding_size)
    w1 = jax.random.normal(k1, (hidden_size, game_size), jnp.float32) * 0.1
    w2 = jax.random.normal(k2, (1, hidden_size), jnp.float32) * 0.1
    wlin = jax.random.normal(k3, (hidden_size, embedding_size), jnp.float32) * 0.1

    out = informed_sender_forward(x, w1, w2, wlin, temp)
    out = jax.block_until_ready(out)

    ref = informed_sender_reference(x, w1, w2, wlin, temp)
    np.testing.assert_allclose(np.asarray(out), np.asarray(ref),
                               rtol=1e-5, atol=1e-5)

    print("KERNEL_OK")
</pallas_src>

<mosaic_0001>
module attributes {stable_mosaic.version = 11 : i64} {
  func.func @informed_sender_kernel(%arg0: memref<2x4x16xf32, #tpu.memory_space<vmem>>, %arg1: memref<32x4xf32, #tpu.memory_space<vmem>>, %arg2: memref<32x1xf32, #tpu.memory_space<vmem>>, %arg3: memref<32x16xf32, #tpu.memory_space<vmem>>, %arg4: memref<2x32xf32, #tpu.memory_space<vmem>>) attributes {dimension_semantics = [], scalar_prefetch = 0 : i64, scratch_operands = 0 : i64, tpu.core_type = #tpu.core_type<tc>} {
    %c0 = arith.constant 0 : index
    %c0_0 = arith.constant 0 : index
    %c0_1 = arith.constant 0 : index
    %0 = vector.load %arg0[%c0, %c0_0, %c0_1] : memref<2x4x16xf32, #tpu.memory_space<vmem>>, vector<2x4x16xf32>
    %c0_2 = arith.constant 0 : index
    %c0_3 = arith.constant 0 : index
    %1 = vector.load %arg1[%c0_2, %c0_3] : memref<32x4xf32, #tpu.memory_space<vmem>>, vector<32x4xf32>
    %2 = vector.shape_cast %1 : vector<32x4xf32> to vector<1x32x4xf32>
    %3 = vector.shape_cast %2 : vector<1x32x4xf32> to vector<1x32x4xf32>
    %4 = vector.broadcast %3 : vector<1x32x4xf32> to vector<2x32x4xf32>
    %cst = arith.constant dense<0.000000e+00> : vector<2x32x16xf32>
    %5 = tpu.matmul %4, %0, %cst {dimension_numbers = #tpu.dot_dimension_numbers<[2], [1], [1], [2], [0, 0, 0, 1, 1, 2], [0], [0]>} : vector<2x32x4xf32>, vector<2x4x16xf32>, vector<2x32x16xf32> -> vector<2x32x16xf32>
    %cst_4 = arith.constant 0.000000e+00 : f32
    %6 = vector.broadcast %cst_4 : f32 to vector<2x32x16xf32>
    %7 = arith.cmpf oge, %5, %6 : vector<2x32x16xf32>
    %cst_5 = arith.constant 0.00999999977 : f32
    %8 = vector.broadcast %cst_5 : f32 to vector<2x32x16xf32>
    %9 = arith.mulf %8, %5 : vector<2x32x16xf32>
    %10 = arith.select %7, %5, %9 : vector<2x32x16xi1>, vector<2x32x16xf32>
    %c0_6 = arith.constant 0 : index
    %c0_7 = arith.constant 0 : index
    %11 = vector.load %arg2[%c0_6, %c0_7] : memref<32x1xf32, #tpu.memory_space<vmem>>, vector<32x1xf32>
    %cst_8 = arith.constant 1.42857146 : f32
    %12 = vector.broadcast %cst_8 : f32 to vector<32x1xf32>
    %13 = arith.mulf %11, %12 : vector<32x1xf32>
    %14 = vector.shape_cast %13 : vector<32x1xf32> to vector<1x32x1xf32>
    %15 = vector.broadcast %14 : vector<1x32x1xf32> to vector<2x32x16xf32>
    %16 = arith.mulf %15, %10 : vector<2x32x16xf32>
    %cst_9 = arith.constant dense<0.000000e+00> : vector<2x16xf32>
    %17 = vector.multi_reduction <add>, %16, %cst_9 [1] : vector<2x32x16xf32> to vector<2x16xf32>
    %cst_10 = arith.constant 0.000000e+00 : f32
    %18 = vector.broadcast %cst_10 : f32 to vector<2x16xf32>
    %19 = arith.cmpf oge, %17, %18 : vector<2x16xf32>
    %cst_11 = arith.constant 0.00999999977 : f32
    %20 = vector.broadcast %cst_11 : f32 to vector<2x16xf32>
    %21 = arith.mulf %20, %17 : vector<2x16xf32>
    %22 = arith.select %19, %17, %21 : vector<2x16xi1>, vector<2x16xf32>
    %c0_12 = arith.constant 0 : index
    %c0_13 = arith.constant 0 : index
    %23 = vector.load %arg3[%c0_12, %c0_13] : memref<32x16xf32, #tpu.memory_space<vmem>>, vector<32x16xf32>
    %cst_14 = arith.constant dense<0.000000e+00> : vector<2x32xf32>
    %24 = tpu.matmul %22, %23, %cst_14 {dimension_numbers = #tpu.dot_dimension_numbers<[1], [1], [0], [0], [0, 0, 1, 0], [], []>} : vector<2x16xf32>, vector<32x16xf32>, vector<2x32xf32> -> vector<2x32xf32>
    %c0_15 = arith.constant 0 : index
    %c0_16 = arith.constant 0 : index
    %25 = vector.load %arg4[%c0_15, %c0_16] : memref<2x32xf32, #tpu.memory_space<vmem>>, vector<2x32xf32>
    tpu.vector_store %arg4[%c0_15, %c0_16], %24 {strides = array<i32>} : memref<2x32xf32, #tpu.memory_space<vmem>>, vector<2x32xf32>,
    return
  }
}

</mosaic_0001>

<bundles_post_ra>
// kernel: tpu_custom_call.1
= control target key start
LH: loop header
LB: loop body
LE: loop exit
PB: predicated region body
PF: predicated region fallthrough
CT: control target
= control target key end

     0   :  { %vm37_vm0 = vcmask 1043456   ;;  %vm24_vm1 = vcmask 31744   ;;  %v302_v8 = vmov 0   ;;  %s395_s0 = inlined_call_operand.vmem [shape: f32[2,4,16], index: 0, kind: input, shape index: {}]   ;;  %s396_s1 = inlined_call_operand.vmem [shape: f32[32,4], index: 1, kind: input, shape index: {}]   ;;  %s397_s2 = inlined_call_operand.vmem [shape: f32[32,1], index: 2, kind: input, shape index: {}]   ;;  %s398_s3 = inlined_call_operand.vmem [shape: f32[32,16], index: 3, kind: input, shape index: {}]   ;;  %s399_s4 = inlined_call_operand.hbm [shape: f32[2,32], index: 4, kind: output, shape index: {}]  }
   0x1   :  { %v18_v0 = vld [vmem:[%s395_s0] sm:$0xf]  ;;  %v19_v1 = vld [vmem:[%s395_s0 + $0x4] sm:$0xf]  ;;  %v21_v3 = vld [vmem:[%s396_s1 + $0x8] sm:$0xff]  ;;  %274 = vset.pattern.permute.xlu0 %v302_v8 }
   0x2   :  { %v20_v2 = vld [vmem:[%s396_s1] sm:$0xff]  ;;  %255 = vmatpush.msk.msra.mxu0 %vm37_vm0, %v18_v0  ;;  %270 = vmatpush.msk.msra.mxu3 %vm37_vm0, %v18_v0  ;;  %v128_v6 = vld [vmem:[%s397_s2 + $0x10] sm:$0xff] }
   0x3   :  { %v126_v4 = vld [vmem:[%s397_s2] sm:$0xff]  ;;  %271 = vmatpush.msk.msra.mxu1 %vm37_vm0, %v19_v1  ;;  %256 = vmatmul.msk.f32.vlgmr.msra.gmra.mxu0 %vm24_vm1, %v20_v2  ;;  %v132_v7 = vmul.f32 1.4285715, %v128_v6 }
   0x4   :  { %v130_v5 = vmul.f32 1.4285715, %v126_v4  ;;  %257 = vmatmul.msk.f32.vlgmr.msra.gmra.mxu3 %vm24_vm1, %v21_v3  ;;  %262 = vmatmul.msk.f32.vlgmr.msra.gmra.mxu1 %vm24_vm1, %v21_v3 }
   0x5   :  { %260 = vmatpush.msk.msrb.mxu0 %vm37_vm0, %v19_v1 }
   0x6   :  { %9 = vsyncpa [#allocation3], 0  ;;  %136 = vperm.xlu0 %274, %v130_v5   ;;  %275 = vset.pattern.permute.xlu1 %v302_v8  ;;  %v127_v9 = vld [vmem:[%s397_s2 + $0x8] sm:$0xff]  ;;  %v129_v10 = vld [vmem:[%s397_s2 + $0x18] sm:$0xff]  ;;  %vm162_vm2 = vcmask 130048   ;;  %vm201_vm13 = vcmask 1041409  }
   0x7   :  { %146 = vperm.xlu1 %275, %v132_v7   ;;  %v22_v11 = vld [vmem:[%s396_s1 + $0x10] sm:$0xff]  ;;  %v131_v12 = vmul.f32 1.4285715, %v127_v9  ;;  %v133_v13 = vmul.f32 1.4285715, %v129_v10  ;;  %v23_v14 = vld [vmem:[%s396_s1 + $0x18] sm:$0xff] }
   0x8   :  { %v198_v17 = vld [vmem:[%s398_s3 + $0x18] sm:$0xff]  ;;  %v197_v19 = vld [vmem:[%s398_s3 + $0x10] sm:$0xff]  ;;  %v196_v21 = vld [vmem:[%s398_s3 + $0x8] sm:$0xff]  ;;  %s246_s17 = sshll.u32 %s399_s4, 4  ;;  %vm237_vm14 = vcmask 254976   ;;  %s247_s17 = int_to_ptr.hbm [resolvable:$true] %s246_s17 }
   0x9   :  { %265 = vmatpush.xpose.msk.msra.mxu2 %vm162_vm2, %v198_v17  ;;  %v195_v30 = vld [vmem:[%s398_s3] sm:$0xff]  ;;  %s303_s3 = smov [#allocation2]  }
   0xa   :  { %s244_s14 = sshll.u32 %s303_s3, 4  ;;  %s245_s14 = int_to_ptr.vmem [resolvable:$true] %s244_s14 }
   0xb   :  { %261 = vmatmul.msk.f32.vlgmr.msrb.gmra.mxu0 %vm24_vm1, %v20_v2 }
   0xc   :  { %258 = vmatmul.msk.f32.gmra.mxu3 %vm24_vm1, %v22_v11  ;;  %263 = vmatmul.msk.f32.gmra.mxu1 %vm24_vm1, %v22_v11 }
   0xd   :  { %266 = vmatpush.xpose.msk.msra.mxu2 %vm162_vm2, %v197_v19 }
   0xe   :  { %141 = vperm.xlu0 %274, %v131_v12  }
   0xf   :  { %151 = vperm.xlu1 %275, %v133_v13  }
  0x11   :  { %267 = vmatpush.xpose.msk.msra.mxu2 %vm162_vm2, %v196_v21 }
  0x14   :  { %259 = vmatmul.msk.f32.gmra.mxu3 %vm24_vm1, %v23_v14  ;;  %264 = vmatmul.msk.f32.gmra.mxu1 %vm24_vm1, %v23_v14 }
  0x15   :  { %268 = vmatpush.xpose.msk.msra.mxu2 %vm162_vm2, %v195_v30 }
  0x78   :  { %v137_v15 = vpop.permute.xlu0 %136 }
  0x79   :  { %v147_v29 = vpop.permute.xlu1 %146 }
  0x80   :  { %v58_v16 = vpop.f32.mrf.mxu0  ;;  %v142_v26 = vpop.permute.xlu0 %141 }
  0x81   :  { %v93_v18 = vpop.f32.mrf.mxu1  ;;  %v110_v32 = vmul.f32 0.01, %v58_v16  ;;  %vm102_vm6 = vcmp.ge.f32.partialorder %v58_v16, 0.0  ;;  %v152_v51 = vpop.permute.xlu1 %151 }
  0x82   :  { %v115_v20 = vmul.f32 0.01, %v93_v18  ;;  %vm107_vm3 = vcmp.ge.f32.partialorder %v93_v18, 0.0 }
  0x83   :  { %v118_v40 = vsel %vm102_vm6, %v58_v16, %v110_v32 }
  0x84   :  { %v123_v27 = vsel %vm107_vm3, %v93_v18, %v115_v20  ;;  %v154_v48 = vmul.f32 %v137_v15, %v118_v40 }
  0x85   :  { %v159_v36 = vmul.f32 %v142_v26, %v123_v27 }
  0x86   :  { %v163_v56 = vsel %vm162_vm2, %v154_v48, 0.0 }
  0x87   :  { %v61_v22 = vpop.f32.mrf.mxu3  ;;  %v177_v43 = vsel %vm162_vm2, %v159_v36, 0.0 }
  0x88   :  { %v90_v23 = vpop.f32.mrf.mxu0  ;;  %v111_v33 = vmul.f32 0.01, %v61_v22  ;;  %vm103_vm7 = vcmp.ge.f32.partialorder %v61_v22, 0.0 }
  0x89   :  { %vm106_vm4 = vcmp.ge.f32.partialorder %v90_v23, 0.0  ;;  %v114_v24 = vmul.f32 0.01, %v90_v23  ;;  %v96_v25 = vpop.f32.mrf.mxu1 }
  0x8a   :  { %vm108_vm5 = vcmp.ge.f32.partialorder %v96_v25, 0.0  ;;  %v116_v28 = vmul.f32 0.01, %v96_v25  ;;  %v119_v41 = vsel %vm103_vm7, %v61_v22, %v111_v33 }
  0x8b   :  { %v122_v31 = vsel %vm106_vm4, %v90_v23, %v114_v24  ;;  %v155_v49 = vmul.f32 %v142_v26, %v119_v41 }
  0x8c   :  { %v158_v34 = vmul.f32 %v137_v15, %v122_v31  ;;  %v124_v35 = vsel %vm108_vm5, %v96_v25, %v116_v28 }
  0x8d   :  { %v160_v38 = vmul.f32 %v147_v29, %v124_v35  ;;  %v164_v57 = vsel %vm162_vm2, %v155_v49, 0.0 }
  0x8e   :  { %v176_v37 = vsel %vm162_vm2, %v158_v34, 0.0  ;;  %v165_v63 = vadd.f32 %v164_v57, %v163_v56 }
  0x8f   :  { %v64_v39 = vpop.f32.mrf.mxu3  ;;  %v178_v45 = vadd.f32 %v177_v43, %v176_v37  ;;  %v179_v50 = vsel %vm162_vm2, %v160_v38, 0.0 }
  0x90   :  { %vm104_vm8 = vcmp.ge.f32.partialorder %v64_v39, 0.0  ;;  %v112_v42 = vmul.f32 0.01, %v64_v39 }
  0x91   :  { %v99_v44 = vpop.f32.mrf.mxu1  ;;  %v180_v55 = vadd.f32 %v179_v50, %v178_v45 }
  0x92   :  { %v120_v46 = vsel %vm104_vm8, %v64_v39, %v112_v42  ;;  %vm109_vm9 = vcmp.ge.f32.partialorder %v99_v44, 0.0  ;;  %v117_v47 = vmul.f32 0.01, %v99_v44 }
  0x93   :  { %v156_v53 = vmul.f32 %v147_v29, %v120_v46 }
  0x94   :  { %v125_v52 = vsel %vm109_vm9, %v99_v44, %v117_v47 }
  0x95   :  { %v161_v54 = vmul.f32 %v152_v51, %v125_v52  ;;  %v166_v62 = vsel %vm162_vm2, %v156_v53, 0.0 }
  0x96   :  { %v167_v3 = vadd.f32 %v166_v62, %v165_v63 }
  0x97   :  { %v181_v58 = vsel %vm162_vm2, %v161_v54, 0.0  ;;  %v67_v59 = vpop.f32.mrf.mxu3 }
  0x98   :  { %v182_v60 = vadd.f32 %v181_v58, %v180_v55  ;;  %vm105_vm10 = vcmp.ge.f32.partialorder %v67_v59, 0.0  ;;  %v113_v61 = vmul.f32 0.01, %v67_v59 }
  0x9a   :  { %v183_v0 = vrot.slane %v182_v60, 4  ;;  %v121_v1 = vsel %vm105_vm10, %v67_v59, %v113_v61 }
  0x9b   :  { %v157_v2 = vmul.f32 %v152_v51, %v121_v1 }
  0x9c   :  { %v184_v4 = vadd.f32 %v183_v0, %v182_v60 }
  0x9d   :  { %v168_v5 = vsel %vm162_vm2, %v157_v2, 0.0 }
  0x9e   :  { %v185_v6 = vrot.slane %v184_v4, 2  ;;  %v169_v7 = vadd.f32 %v168_v5, %v167_v3 }
  0xa0   :  { %v186_v8 = vadd.f32 %v185_v6, %v184_v4  ;;  %v170_v9 = vrot.slane %v169_v7, 4 }
  0xa2   :  { %v187_v10 = vrot.slane %v186_v8, 1  ;;  %v171_v11 = vadd.f32 %v170_v9, %v169_v7 }
  0xa4   :  { %v172_v12 = vrot.slane %v171_v11, 2  ;;  %v188_v14 = vadd.f32 %v187_v10, %v186_v8 }
  0xa6   :  { %v173_v13 = vadd.f32 %v172_v12, %v171_v11  ;;  %v192_v17 = vmul.f32 0.01, %v188_v14  ;;  %vm190_vm11 = vcmp.ge.f32.partialorder %v188_v14, 0.0 }
  0xa8   :  { %v174_v15 = vrot.slane %v173_v13, 1  ;;  %v194_v20 = vsel %vm190_vm11, %v188_v14, %v192_v17 }
  0xaa   :  { %v175_v16 = vadd.f32 %v174_v15, %v173_v13 }
  0xac   :  { %vm189_vm12 = vcmp.ge.f32.partialorder %v175_v16, 0.0  ;;  %v191_v18 = vmul.f32 0.01, %v175_v16 }
  0xae   :  { %v193_v19 = vsel %vm189_vm12, %v175_v16, %v191_v18 }
  0xaf   :  { %v202_v21 = vsel %vm201_vm13, %v194_v20, %v193_v19 }
  0xb0   :  { %269 = vmatmul.msk.f32.vlgmr.msra.gmra.mxu2 %vm162_vm2, %v202_v21 }
 0x133   :  { %v234_v22 = vpop.f32.mrf.mxu2 }
 0x134   :  { %238 = vst.msk [vmem:[#allocation2] sm:$0x3] %vm237_vm14, %v234_v22 }
 0x135   :  { %249 = dma.vmem_to_hbm [thread:$0]  %s245_s14, 32, %s247_s17, [#allocation3]  }
 0x136   :  { %300 = dma.done.wait [#allocation3], 32  }
 0x137   :  { %301 = vsyncadd [#allocation3], 4294967264 }
 0x138   :  { %254 = vsyncpa [#allocation3], 1 }

</bundles_post_ra>
